<compile_context>
chip_gen: v7x
topology: tpu7x:2x2x1
jax: 0.10.0
libtpu: 0.0.40
codegen_flags: <defaults>
</compile_context>

<pallas_src>
from functools import partial

import jax
import jax.numpy as jnp
from jax.experimental import pallas as pl
from jax.experimental.pallas import tpu as pltpu


_LANE = 128                    # lane-dense input width (multiple of 128)
_BLK_ROWS = 4096               # (4096, 128) f32 block = 2 MiB / stream / buffer
_PALLAS_MIN_ELEMS = 128 * 1024 # below this, plain XLA beats kernel setup


def _num_partitions():
    """2-way grid split only on chips with 2 TensorCores per JAX device."""
    try:
        kind = jax.devices()[0].device_kind.lower()
    except Exception:
        return 1
    for tag in ("v4", "v5p", "v7", "7x"):
        if tag in kind:
            return 2
    return 1  # v5e / v6e: single TensorCore -> extra partition is pure overhead


def _sum_sq_err(pred2d, true2d, blk_rows, parts):
    """sum((pred - true)^2) over two equal-shape (rows, LANE) arrays."""
    n_rows, lane = pred2d.shape
    nblk = -(-n_rows // blk_rows)      # row-blocks actually containing data
    steps = -(-nblk // parts)          # inner ("arbitrary") reduction length

    def kernel(p_ref, t_ref, o_ref, acc_ref):
        s = pl.program_id(1)

        @pl.when(s == 0)
        def _init():
            acc_ref[...] = jnp.zeros_like(acc_ref)

        # Global row-block id; blocks past the real data (partition padding or
        # the ragged tail of the last block) are masked to contribute zero.
        blk_id = pl.program_id(0) * pl.num_programs(1) + s
        n_valid = n_rows - blk_id * blk_rows           # static n_rows, traced blk_id
        row = jax.lax.broadcasted_iota(jnp.int32, (blk_rows, lane), 0)

        d = p_ref[...].astype(jnp.float32) - t_ref[...].astype(jnp.float32)
        acc_ref[...] += jnp.where(row < n_valid, d * d, jnp.float32(0.0))

        @pl.when(s == pl.num_programs(1) - 1)
        def _fini():
            # Collapse the (blk_rows, LANE) accumulator to one lane-dense row;
            # only this tiny tile is written back to HBM.
            o_ref[...] = jnp.sum(acc_ref[...], axis=0, keepdims=True)

    def in_map(p, s):
        # Clamp so the DMA never targets a fully out-of-range block; the
        # kernel-side mask zeroes any duplicated/tail rows.
        return (jnp.minimum(p * steps + s, nblk - 1), 0)

    in_spec = pl.BlockSpec((blk_rows, lane), in_map)
    out_spec = pl.BlockSpec((None, 1, lane), lambda p, s: (p, 0, 0))

    cost = pl.CostEstimate(
        flops=3 * int(pred2d.size),
        transcendentals=0,
        bytes_accessed=int(pred2d.nbytes + true2d.nbytes + parts * lane * 4),
    )

    partials = pl.pallas_call(
        kernel,
        out_shape=jax.ShapeDtypeStruct((parts, 1, lane), jnp.float32),
        grid=(parts, steps),
        in_specs=[in_spec, in_spec],
        out_specs=out_spec,
        scratch_shapes=[pltpu.VMEM((blk_rows, lane), jnp.float32)],
        compiler_params=pltpu.CompilerParams(
            dimension_semantics=("parallel", "arbitrary"),
            vmem_limit_bytes=32 * 1024 * 1024),
        cost_estimate=cost,
    )(pred2d, true2d)

    return jnp.sum(partials)


def _mse_pair(pred, true):
    """Mean squared error between pred and true (true broadcast to pred)."""
    true = jnp.broadcast_to(true, pred.shape)
    n = pred.size

    p = pred.reshape(-1)
    t = true.reshape(-1)

    if n < _PALLAS_MIN_ELEMS:
        # Small-input fast path: pipeline/grid setup would dominate.
        d = p.astype(jnp.float32) - t.astype(jnp.float32)
        return jnp.sum(d * d) / jnp.float32(n)

    lane = _LANE
    rem = n % lane
    if rem:
        # TODO(synk): the sub-128 ragged tail still goes through jnp.pad (one
        # extra copy); row-level raggedness is handled by in-kernel masking.
        pad = lane - rem
        p = jnp.pad(p, (0, pad))
        t = jnp.pad(t, (0, pad))

    n_rows = p.size // lane
    p2 = p.reshape(n_rows, lane)   # free bitcast-reshape when rem == 0
    t2 = t.reshape(n_rows, lane)

    blk_rows = min(_BLK_ROWS, ((n_rows + 31) // 32) * 32)
    parts = _num_partitions()

    total_sq = _sum_sq_err(p2, t2, blk_rows, parts)
    return total_sq / jnp.float32(n)


@partial(jax.jit, static_argnames=("kind", "with_restore", "alpha"))
def cleaning_loss(y_pred_extract, y_pred_restore, y_true_extract, y_true_restore,
                  kind="MSE", with_restore=True, alpha=1):
    # TODO(synk): BCE variant (kind != 'MSE') not implemented; MSE is the default.
    assert kind == "MSE"
    del alpha  # defined in the torch module's __init__ but unused in its forward

    yte = y_true_extract[:, None, ...]   # unsqueeze(1)
    ytr = y_true_restore[:, None, ...]

    loss = jnp.float32(0.0)
    if with_restore:
        loss = loss + _mse_pair(y_pred_restore, ytr)
    loss = loss + _mse_pair(y_pred_extract, yte)
    return loss


if __name__ == "__main__":
    key = jax.random.PRNGKey(0)
    k1, k2, k3, k4 = jax.random.split(key, 4)

    # (a) Main case: lane-aligned (2*256*256 = 131072 elems) -> zero-copy
    #     reshape straight into the Pallas kernel, with_restore=True.
    B, H, W = 2, 256, 256
    y_pred_extract = jax.random.uniform(k1, (B, 1, H, W), dtype=jnp.float32)
    y_pred_restore = jax.random.uniform(k2, (B, 1, H, W), dtype=jnp.float32)
    y_true_extract = jax.random.uniform(k3, (B, H, W), dtype=jnp.float32)
    y_true_restore = jax.random.uniform(k4, (B, H, W), dtype=jnp.float32)

    loss = jax.block_until_ready(
        cleaning_loss(y_pred_extract, y_pred_restore,
                      y_true_extract, y_true_restore))
    ref = (jnp.mean((y_pred_restore - y_true_restore[:, None]) ** 2)
           + jnp.mean((y_pred_extract - y_true_extract[:, None]) ** 2))
    assert jnp.allclose(loss, ref, rtol=1e-4, atol=1e-6), (loss, ref)

    # (b) Multi-block case with a partial (masked) last block, with_restore=False.
    k5, k6, k7, k8 = jax.random.split(jax.random.PRNGKey(1), 4)
    pe_b = jax.random.uniform(k5, (1, 1, 800, 800), dtype=jnp.float32)
    pr_b = jax.random.uniform(k6, (1, 1, 800, 800), dtype=jnp.float32)
    te_b = jax.random.uniform(k7, (1, 800, 800), dtype=jnp.float32)
    tr_b = jax.random.uniform(k8, (1, 800, 800), dtype=jnp.float32)
    loss_b = jax.block_until_ready(
        cleaning_loss(pe_b, pr_b, te_b, tr_b, with_restore=False))
    ref_b = jnp.mean((pe_b - te_b[:, None]) ** 2)
    assert jnp.allclose(loss_b, ref_b, rtol=1e-4, atol=1e-6), (loss_b, ref_b)

    # (c) Non-lane-aligned large input (exercises the tail-pad fallback + mask).
    k9, k10, k11, k12 = jax.random.split(jax.random.PRNGKey(2), 4)
    pe_c = jax.random.uniform(k9, (1, 1, 367, 367), dtype=jnp.float32)
    pr_c = jax.random.uniform(k10, (1, 1, 367, 367), dtype=jnp.float32)
    te_c = jax.random.uniform(k11, (1, 367, 367), dtype=jnp.float32)
    tr_c = jax.random.uniform(k12, (1, 367, 367), dtype=jnp.float32)
    loss_c = jax.block_until_ready(cleaning_loss(pe_c, pr_c, te_c, tr_c))
    ref_c = (jnp.mean((pr_c - tr_c[:, None]) ** 2)
             + jnp.mean((pe_c - te_c[:, None]) ** 2))
    assert jnp.allclose(loss_c, ref_c, rtol=1e-4, atol=1e-6), (loss_c, ref_c)

    # (d) Tiny input: pure-XLA fast path (no Pallas launch).
    k13, k14, k15, k16 = jax.random.split(jax.random.PRNGKey(3), 4)
    pe_d = jax.random.uniform(k13, (2, 1, 13, 17), dtype=jnp.float32)
    pr_d = jax.random.uniform(k14, (2, 1, 13, 17), dtype=jnp.float32)
    te_d = jax.random.uniform(k15, (2, 13, 17), dtype=jnp.float32)
    tr_d = jax.random.uniform(k16, (2, 13, 17), dtype=jnp.float32)
    loss_d = jax.block_until_ready(cleaning_loss(pe_d, pr_d, te_d, tr_d))
    ref_d = (jnp.mean((pr_d - tr_d[:, None]) ** 2)
             + jnp.mean((pe_d - te_d[:, None]) ** 2))
    assert jnp.allclose(loss_d, ref_d, rtol=1e-5, atol=1e-6), (loss_d, ref_d)

    print("KERNEL_OK")
</pallas_src>

<mosaic_0001>
module attributes {stable_mosaic.version = 11 : i64} {
  func.func @kernel(%arg0: i32, %arg1: i32, %arg2: memref<1024x128xf32, #tpu.memory_space<vmem>>, %arg3: memref<1024x128xf32, #tpu.memory_space<vmem>>, %arg4: memref<1x1x128xf32, #tpu.memory_space<vmem>>, %arg5: memref<1024x128xf32, #tpu.memory_space<vmem>>) attributes {dimension_semantics = [#tpu.dimension_semantics<parallel>, #tpu.dimension_semantics<arbitrary>], iteration_bounds = array<i64: 1, 1>, scalar_prefetch = 0 : i64, scratch_operands = 1 : i64, tpu.core_type = #tpu.core_type<tc>, window_params = [{transform_indices = @transform_0, window_bounds = array<i64: 1024, 128>}, {transform_indices = @transform_1, window_bounds = array<i64: 1024, 128>}, {transform_indices = @transform_2, window_bounds = array<i64: 1, 1, 128>}]} {
    %c0_i32 = arith.constant 0 : i32
    %0 = arith.cmpi eq, %arg1, %c0_i32 : i32
    %1 = arith.extui %0 : i1 to i32
    %c0_i32_0 = arith.constant 0 : i32
    %2 = arith.cmpi ne, %1, %c0_i32_0 : i32
    scf.if %2 {
      %cst_11 = arith.constant 0.000000e+00 : f32
      %22 = vector.broadcast %cst_11 : f32 to vector<1024x128xf32>
      %c0_12 = arith.constant 0 : index
      %c0_13 = arith.constant 0 : index
      %23 = vector.load %arg5[%c0_12, %c0_13] : memref<1024x128xf32, #tpu.memory_space<vmem>>, vector<1024x128xf32>
      tpu.vector_store %arg5[%c0_12, %c0_13], %22 {strides = array<i32>} : memref<1024x128xf32, #tpu.memory_space<vmem>>, vector<1024x128xf32>,
    } else {
    }
    %c1_i32 = arith.constant 1 : i32
    %3 = arith.muli %arg0, %c1_i32 : i32
    %4 = arith.addi %3, %arg1 : i32
    %c1024_i32 = arith.constant 1024 : i32
    %5 = arith.muli %4, %c1024_i32 : i32
    %c1024_i32_1 = arith.constant 1024 : i32
    %6 = arith.subi %c1024_i32_1, %5 : i32
    %7 = tpu.iota {dimensions = array<i32: 0>} : vector<1024x128xi32>
    %c0 = arith.constant 0 : index
    %c0_2 = arith.constant 0 : index
    %8 = vector.load %arg2[%c0, %c0_2] : memref<1024x128xf32, #tpu.memory_space<vmem>>, vector<1024x128xf32>
    %c0_3 = arith.constant 0 : index
    %c0_4 = arith.constant 0 : index
    %9 = vector.load %arg3[%c0_3, %c0_4] : memref<1024x128xf32, #tpu.memory_space<vmem>>, vector<1024x128xf32>
    %10 = arith.subf %8, %9 : vector<1024x128xf32>
    %c0_5 = arith.constant 0 : index
    %c0_6 = arith.constant 0 : index
    %11 = vector.load %arg5[%c0_5, %c0_6] : memref<1024x128xf32, #tpu.memory_space<vmem>>, vector<1024x128xf32>
    %12 = vector.broadcast %6 : i32 to vector<1024x128xi32>
    %13 = arith.cmpi slt, %7, %12 : vector<1024x128xi32>
    %14 = arith.mulf %10, %10 : vector<1024x128xf32>
    %cst = arith.constant 0.000000e+00 : f32
    %15 = vector.broadcast %cst : f32 to vector<1024x128xf32>
    %16 = arith.select %13, %14, %15 : vector<1024x128xi1>, vector<1024x128xf32>
    %17 = arith.addf %11, %16 : vector<1024x128xf32>
    %c0_7 = arith.constant 0 : index
    %c0_8 = arith.constant 0 : index
    %18 = vector.load %arg5[%c0_7, %c0_8] : memref<1024x128xf32, #tpu.memory_space<vmem>>, vector<1024x128xf32>
    tpu.vector_store %arg5[%c0_7, %c0_8], %17 {strides = array<i32>} : memref<1024x128xf32, #tpu.memory_space<vmem>>, vector<1024x128xf32>,
    %c0_i32_9 = arith.constant 0 : i32
    %19 = arith.cmpi eq, %arg1, %c0_i32_9 : i32
    %20 = arith.extui %19 : i1 to i32
    %c0_i32_10 = arith.constant 0 : i32
    %21 = arith.cmpi ne, %20, %c0_i32_10 : i32
    scf.if %21 {
      %c0_11 = arith.constant 0 : index
      %c0_12 = arith.constant 0 : index
      %22 = vector.load %arg5[%c0_11, %c0_12] : memref<1024x128xf32, #tpu.memory_space<vmem>>, vector<1024x128xf32>
      %cst_13 = arith.constant dense<0.000000e+00> : vector<128xf32>
      %23 = vector.multi_reduction <add>, %22, %cst_13 [0] : vector<1024x128xf32> to vector<128xf32>
      %24 = vector.shape_cast %23 : vector<128xf32> to vector<1x128xf32>
      %c0_14 = arith.constant 0 : index
      %c0_15 = arith.constant 0 : index
      %c0_16 = arith.constant 0 : index
      %25 = vector.load %arg4[%c0_14, %c0_15, %c0_16] : memref<1x1x128xf32, #tpu.memory_space<vmem>>, vector<1x1x128xf32>
      %26 = vector.shape_cast %25 : vector<1x1x128xf32> to vector<1x128xf32>
      %27 = vector.shape_cast %24 : vector<1x128xf32> to vector<1x1x128xf32>
      tpu.vector_store %arg4[%c0_14, %c0_15, %c0_16], %27 {strides = array<i32>} : memref<1x1x128xf32, #tpu.memory_space<vmem>>, vector<1x1x128xf32>,
    } else {
    }
    return
  }
  func.func @transform_0(%arg0: i32, %arg1: i32) -> (i32, i32) {
    %c1_i32 = arith.constant 1 : i32
    %0 = arith.muli %arg0, %c1_i32 : i32
    %1 = arith.addi %0, %arg1 : i32
    %c0_i32 = arith.constant 0 : i32
    %2 = arith.minsi %1, %c0_i32 : i32
    %c0_i32_0 = arith.constant 0 : i32
    %c0_i32_1 = arith.constant 0 : i32
    return %2, %c0_i32_0 : i32, i32
  }
  func.func @transform_1(%arg0: i32, %arg1: i32) -> (i32, i32) {
    %c1_i32 = arith.constant 1 : i32
    %0 = arith.muli %arg0, %c1_i32 : i32
    %1 = arith.addi %0, %arg1 : i32
    %c0_i32 = arith.constant 0 : i32
    %2 = arith.minsi %1, %c0_i32 : i32
    %c0_i32_0 = arith.constant 0 : i32
    %c0_i32_1 = arith.constant 0 : i32
    return %2, %c0_i32_0 : i32, i32
  }
  func.func @transform_2(%arg0: i32, %arg1: i32) -> (i32, i32, i32) {
    %c0_i32 = arith.constant 0 : i32
    %c0_i32_0 = arith.constant 0 : i32
    %c0_i32_1 = arith.constant 0 : i32
    return %arg0, %c0_i32, %c0_i32_0 : i32, i32, i32
  }
}

</mosaic_0001>

<bundles_post_ra>
// kernel: cleaning_loss.2
= control target key start
LH: loop header
LB: loop body
LE: loop exit
PB: predicated region body
PF: predicated region fallthrough
CT: control target
= control target key end

     0   :  { %s2939_s0 = inlined_call_operand.vmem [shape: f32[1024,128], index: 0, kind: input, shape index: {}]   ;;  %s2940_s1 = inlined_call_operand.vmem [shape: f32[1024,128], index: 1, kind: input, shape index: {}]   ;;  %s2941_s2 = inlined_call_operand.vmem [shape: f32[1,1,128], index: 2, kind: output, shape index: {}]  }
   0x1   :  { %v372_v0 = vld [vmem:[%s2939_s0 + $0x108] sm:$0xff]  ;;  %v373_v1 = vld [vmem:[%s2939_s0 + $0x110] sm:$0xff]  ;;  %v374_v2 = vld [vmem:[%s2939_s0 + $0x118] sm:$0xff] }
   0x2   :  { %v375_v3 = vld [vmem:[%s2939_s0 + $0x120] sm:$0xff]  ;;  %v376_v4 = vld [vmem:[%s2939_s0 + $0x128] sm:$0xff]  ;;  %v377_v5 = vld [vmem:[%s2939_s0 + $0x130] sm:$0xff] }
   0x3   :  { %v378_v6 = vld [vmem:[%s2939_s0 + $0x138] sm:$0xff]  ;;  %v379_v7 = vld [vmem:[%s2939_s0 + $0x140] sm:$0xff]  ;;  %v380_v8 = vld [vmem:[%s2939_s0 + $0x148] sm:$0xff] }
   0x4   :  { %v381_v9 = vld [vmem:[%s2939_s0 + $0x150] sm:$0xff]  ;;  %v382_v10 = vld [vmem:[%s2939_s0 + $0x158] sm:$0xff]  ;;  %v383_v11 = vld [vmem:[%s2939_s0 + $0x160] sm:$0xff] }
   0x5   :  { %v384_v12 = vld [vmem:[%s2939_s0 + $0x168] sm:$0xff]  ;;  %v385_v14 = vld [vmem:[%s2939_s0 + $0x170] sm:$0xff]  ;;  %v386_v15 = vld [vmem:[%s2939_s0 + $0x178] sm:$0xff] }
   0x6   :  { %v500_v13 = vld [vmem:[%s2940_s1 + $0x108] sm:$0xff]  ;;  %v387_v16 = vld [vmem:[%s2939_s0 + $0x180] sm:$0xff]  ;;  %v501_v17 = vld [vmem:[%s2940_s1 + $0x110] sm:$0xff] }
   0x7   :  { %v502_v18 = vld [vmem:[%s2940_s1 + $0x118] sm:$0xff]  ;;  %v503_v19 = vld [vmem:[%s2940_s1 + $0x120] sm:$0xff]  ;;  %v1848_v20 = vsub.f32 %v372_v0, %v500_v13  ;;  %v388_v21 = vld [vmem:[%s2939_s0 + $0x188] sm:$0xff]  ;;  %v1868_v27 = vsub.f32 %v373_v1, %v501_v17 }
   0x8   :  { %v389_v22 = vld [vmem:[%s2939_s0 + $0x190] sm:$0xff]  ;;  %v390_v23 = vld [vmem:[%s2939_s0 + $0x198] sm:$0xff]  ;;  %v504_v24 = vld [vmem:[%s2940_s1 + $0x128] sm:$0xff]  ;;  %v1870_v28 = vsub.f32 %v374_v2, %v502_v18  ;;  %v1872_v29 = vsub.f32 %v375_v3, %v503_v19 }
   0x9   :  { %v505_v25 = vld [vmem:[%s2940_s1 + $0x130] sm:$0xff]  ;;  %v506_v26 = vld [vmem:[%s2940_s1 + $0x138] sm:$0xff]  ;;  %v391_v30 = vld [vmem:[%s2939_s0 + $0x1a0] sm:$0xff]  ;;  %v1892_v36 = vsub.f32 %v376_v4, %v504_v24 }
   0xa   :  { %v392_v31 = vld [vmem:[%s2939_s0 + $0x1a8] sm:$0xff]  ;;  %v393_v32 = vld [vmem:[%s2939_s0 + $0x1b0] sm:$0xff]  ;;  %v507_v33 = vld [vmem:[%s2940_s1 + $0x140] sm:$0xff]  ;;  %v1894_v37 = vsub.f32 %v377_v5, %v505_v25  ;;  %v1896_v38 = vsub.f32 %v378_v6, %v506_v26 }
   0xb   :  { %v508_v34 = vld [vmem:[%s2940_s1 + $0x148] sm:$0xff]  ;;  %v509_v35 = vld [vmem:[%s2940_s1 + $0x150] sm:$0xff]  ;;  %v394_v39 = vld [vmem:[%s2939_s0 + $0x1b8] sm:$0xff]  ;;  %v1916_v45 = vsub.f32 %v379_v7, %v507_v33 }
   0xc   :  { %v395_v40 = vld [vmem:[%s2939_s0 + $0x1c0] sm:$0xff]  ;;  %v396_v41 = vld [vmem:[%s2939_s0 + $0x1c8] sm:$0xff]  ;;  %v510_v42 = vld [vmem:[%s2940_s1 + $0x158] sm:$0xff]  ;;  %v1918_v46 = vsub.f32 %v380_v8, %v508_v34  ;;  %v1920_v47 = vsub.f32 %v381_v9, %v509_v35 }
   0xd   :  { %v511_v43 = vld [vmem:[%s2940_s1 + $0x160] sm:$0xff]  ;;  %v512_v44 = vld [vmem:[%s2940_s1 + $0x168] sm:$0xff]  ;;  %v397_v48 = vld [vmem:[%s2939_s0 + $0x1d0] sm:$0xff]  ;;  %v1940_v54 = vsub.f32 %v382_v10, %v510_v42 }
   0xe   :  { %v398_v49 = vld [vmem:[%s2939_s0 + $0x1d8] sm:$0xff]  ;;  %v399_v50 = vld [vmem:[%s2939_s0 + $0x1e0] sm:$0xff]  ;;  %v513_v51 = vld [vmem:[%s2940_s1 + $0x170] sm:$0xff]  ;;  %v1942_v55 = vsub.f32 %v383_v11, %v511_v43  ;;  %v1944_v56 = vsub.f32 %v384_v12, %v512_v44 }
   0xf   :  { %v514_v52 = vld [vmem:[%s2940_s1 + $0x178] sm:$0xff]  ;;  %v515_v53 = vld [vmem:[%s2940_s1 + $0x180] sm:$0xff]  ;;  %v400_v57 = vld [vmem:[%s2939_s0 + $0x1e8] sm:$0xff]  ;;  %v1964_v63 = vsub.f32 %v385_v14, %v513_v51 }
  0x10   :  { %v401_v58 = vld [vmem:[%s2939_s0 + $0x1f0] sm:$0xff]  ;;  %v402_v59 = vld [vmem:[%s2939_s0 + $0x1f8] sm:$0xff]  ;;  %v516_v60 = vld [vmem:[%s2940_s1 + $0x188] sm:$0xff]  ;;  %v1966_v0 = vsub.f32 %v386_v15, %v514_v52  ;;  %v1968_v1 = vsub.f32 %v387_v16, %v515_v53 }
  0x11   :  { %v517_v61 = vld [vmem:[%s2940_s1 + $0x190] sm:$0xff]  ;;  %v518_v62 = vld [vmem:[%s2940_s1 + $0x198] sm:$0xff]  ;;  %v403_v2 = vld [vmem:[%s2939_s0 + $0x200] sm:$0xff]  ;;  %v1988_v8 = vsub.f32 %v388_v21, %v516_v60 }
  0x12   :  { %v404_v3 = vld [vmem:[%s2939_s0 + $0x208] sm:$0xff]  ;;  %v405_v4 = vld [vmem:[%s2939_s0 + $0x210] sm:$0xff]  ;;  %v519_v5 = vld [vmem:[%s2940_s1 + $0x1a0] sm:$0xff]  ;;  %v1990_v9 = vsub.f32 %v389_v22, %v517_v61  ;;  %v1992_v10 = vsub.f32 %v390_v23, %v518_v62 }
  0x13   :  { %v520_v6 = vld [vmem:[%s2940_s1 + $0x1a8] sm:$0xff]  ;;  %v521_v7 = vld [vmem:[%s2940_s1 + $0x1b0] sm:$0xff]  ;;  %v406_v11 = vld [vmem:[%s2939_s0 + $0x218] sm:$0xff]  ;;  %v2012_v17 = vsub.f32 %v391_v30, %v519_v5 }
  0x14   :  { %v407_v12 = vld [vmem:[%s2939_s0 + $0x220] sm:$0xff]  ;;  %v408_v13 = vld [vmem:[%s2939_s0 + $0x228] sm:$0xff]  ;;  %v522_v14 = vld [vmem:[%s2940_s1 + $0x1b8] sm:$0xff]  ;;  %v2014_v18 = vsub.f32 %v392_v31, %v520_v6  ;;  %v2016_v19 = vsub.f32 %v393_v32, %v521_v7 }
  0x15   :  { %v523_v15 = vld [vmem:[%s2940_s1 + $0x1c0] sm:$0xff]  ;;  %v524_v16 = vld [vmem:[%s2940_s1 + $0x1c8] sm:$0xff]  ;;  %v409_v21 = vld [vmem:[%s2939_s0 + $0x230] sm:$0xff]  ;;  %v2036_v30 = vsub.f32 %v394_v39, %v522_v14 }
  0x16   :  { %v410_v22 = vld [vmem:[%s2939_s0 + $0x238] sm:$0xff]  ;;  %v411_v23 = vld [vmem:[%s2939_s0 + $0x240] sm:$0xff]  ;;  %v525_v24 = vld [vmem:[%s2940_s1 + $0x1d0] sm:$0xff]  ;;  %v2038_v31 = vsub.f32 %v395_v40, %v523_v15  ;;  %v2040_v32 = vsub.f32 %v396_v41, %v524_v16 }
  0x17   :  { %v526_v25 = vld [vmem:[%s2940_s1 + $0x1d8] sm:$0xff]  ;;  %v527_v26 = vld [vmem:[%s2940_s1 + $0x1e0] sm:$0xff]  ;;  %v412_v33 = vld [vmem:[%s2939_s0 + $0x248] sm:$0xff]  ;;  %v2060_v42 = vsub.f32 %v397_v48, %v525_v24 }
  0x18   :  { %v413_v34 = vld [vmem:[%s2939_s0 + $0x250] sm:$0xff]  ;;  %v414_v35 = vld [vmem:[%s2939_s0 + $0x258] sm:$0xff]  ;;  %v528_v39 = vld [vmem:[%s2940_s1 + $0x1e8] sm:$0xff]  ;;  %v2062_v43 = vsub.f32 %v398_v49, %v526_v25  ;;  %v2064_v44 = vsub.f32 %v399_v50, %v527_v26 }
  0x19   :  { %v529_v40 = vld [vmem:[%s2940_s1 + $0x1f0] sm:$0xff]  ;;  %v530_v41 = vld [vmem:[%s2940_s1 + $0x1f8] sm:$0xff]  ;;  %v415_v51 = vld [vmem:[%s2939_s0 + $0x260] sm:$0xff]  ;;  %v2084_v60 = vsub.f32 %v400_v57, %v528_v39 }
  0x1a   :  { %v416_v52 = vld [vmem:[%s2939_s0 + $0x268] sm:$0xff]  ;;  %v417_v53 = vld [vmem:[%s2939_s0 + $0x270] sm:$0xff]  ;;  %v531_v48 = vld [vmem:[%s2940_s1 + $0x200] sm:$0xff]  ;;  %v2086_v61 = vsub.f32 %v401_v58, %v529_v40  ;;  %v2088_v62 = vsub.f32 %v402_v59, %v530_v41 }
  0x1b   :  { %v532_v49 = vld [vmem:[%s2940_s1 + $0x208] sm:$0xff]  ;;  %v533_v50 = vld [vmem:[%s2940_s1 + $0x210] sm:$0xff]  ;;  %v418_v5 = vld [vmem:[%s2939_s0 + $0x278] sm:$0xff]  ;;  %v2108_v14 = vsub.f32 %v403_v2, %v531_v48 }
  0x1c   :  { %v419_v6 = vld [vmem:[%s2939_s0 + $0x280] sm:$0xff]  ;;  %v420_v7 = vld [vmem:[%s2939_s0 + $0x288] sm:$0xff]  ;;  %v534_v57 = vld [vmem:[%s2940_s1 + $0x218] sm:$0xff]  ;;  %v2110_v15 = vsub.f32 %v404_v3, %v532_v49  ;;  %v2112_v16 = vsub.f32 %v405_v4, %v533_v50 }
  0x1d   :  { %v535_v58 = vld [vmem:[%s2940_s1 + $0x220] sm:$0xff]  ;;  %v536_v59 = vld [vmem:[%s2940_s1 + $0x228] sm:$0xff]  ;;  %v421_v24 = vld [vmem:[%s2939_s0 + $0x290] sm:$0xff]  ;;  %v2132_v39 = vsub.f32 %v406_v11, %v534_v57 }
  0x1e   :  { %v422_v25 = vld [vmem:[%s2939_s0 + $0x298] sm:$0xff]  ;;  %v423_v26 = vld [vmem:[%s2939_s0 + $0x2a0] sm:$0xff]  ;;  %v537_v2 = vld [vmem:[%s2940_s1 + $0x230] sm:$0xff]  ;;  %v2134_v40 = vsub.f32 %v407_v12, %v535_v58  ;;  %v2136_v41 = vsub.f32 %v408_v13, %v536_v59 }
  0x1f   :  { %v538_v3 = vld [vmem:[%s2940_s1 + $0x238] sm:$0xff]  ;;  %v539_v4 = vld [vmem:[%s2940_s1 + $0x240] sm:$0xff]  ;;  %2942 = vst [vmem:[#allocation3_spill] sm:$0xff] %v2132_v39  ;;  %v424_v48 = vld [vmem:[%s2939_s0 + $0x2a8] sm:$0xff]  ;;  %v2156_v57 = vsub.f32 %v409_v21, %v537_v2 }
  0x20   :  { %2943 = vst [vmem:[#allocation4_spill] sm:$0xff] %v2134_v40  ;;  %2944 = vst [vmem:[#allocation5_spill] sm:$0xff] %v2136_v41  ;;  %v425_v49 = vld [vmem:[%s2939_s0 + $0x2b0] sm:$0xff]  ;;  %v426_v50 = vld [vmem:[%s2939_s0 + $0x2b8] sm:$0xff]  ;;  %v2158_v58 = vsub.f32 %v410_v22, %v538_v3  ;;  %v2160_v59 = vsub.f32 %v411_v23, %v539_v4 }
  0x21   :  { %v540_v11 = vld [vmem:[%s2940_s1 + $0x248] sm:$0xff]  ;;  %v541_v12 = vld [vmem:[%s2940_s1 + $0x250] sm:$0xff]  ;;  %v542_v13 = vld [vmem:[%s2940_s1 + $0x258] sm:$0xff]  ;;  %2945 = vst [vmem:[#allocation6_spill] sm:$0xff] %v2156_v57 }
  0x22   :  { %2946 = vst [vmem:[#allocation7_spill] sm:$0xff] %v2158_v58  ;;  %2947 = vst [vmem:[#allocation8_spill] sm:$0xff] %v2160_v59  ;;  %v427_v41 = vld [vmem:[%s2939_s0 + $0x2c0] sm:$0xff]  ;;  %v428_v40 = vld [vmem:[%s2939_s0 + $0x2c8] sm:$0xff]  ;;  %v2180_v2 = vsub.f32 %v412_v33, %v540_v11  ;;  %v2182_v3 = vsub.f32 %v413_v34, %v541_v12  ;;  %v2184_v4 = vsub.f32 %v414_v35, %v542_v13 }
  0x23   :  { %v429_v39 = vld [vmem:[%s2939_s0 + $0x2d0] sm:$0xff]  ;;  %v543_v21 = vld [vmem:[%s2940_s1 + $0x260] sm:$0xff]  ;;  %v544_v22 = vld [vmem:[%s2940_s1 + $0x268] sm:$0xff] }
  0x24   :  { %v545_v23 = vld [vmem:[%s2940_s1 + $0x270] sm:$0xff]  ;;  %2948 = vst [vmem:[#allocation9_spill] sm:$0xff] %v2180_v2  ;;  %2949 = vst [vmem:[#allocation10_spill] sm:$0xff] %v2182_v3  ;;  %v430_v59 = vld [vmem:[%s2939_s0 + $0x2d8] sm:$0xff]  ;;  %v2204_v11 = vsub.f32 %v415_v51, %v543_v21  ;;  %v2206_v12 = vsub.f32 %v416_v52, %v544_v22 }
  0x25   :  { %2950 = vst [vmem:[#allocation11_spill] sm:$0xff] %v2184_v4  ;;  %v431_v58 = vld [vmem:[%s2939_s0 + $0x2e0] sm:$0xff]  ;;  %v432_v57 = vld [vmem:[%s2939_s0 + $0x2e8] sm:$0xff]  ;;  %v546_v33 = vld [vmem:[%s2940_s1 + $0x278] sm:$0xff]  ;;  %v2208_v13 = vsub.f32 %v417_v53, %v545_v23 }
  0x26   :  { %v547_v34 = vld [vmem:[%s2940_s1 + $0x280] sm:$0xff]  ;;  %v548_v35 = vld [vmem:[%s2940_s1 + $0x288] sm:$0xff]  ;;  %2951 = vst [vmem:[#allocation12_spill] sm:$0xff] %v2204_v11  ;;  %2952 = vst [vmem:[#allocation13_spill] sm:$0xff] %v2206_v12  ;;  %v2228_v21 = vsub.f32 %v418_v5, %v546_v33 }
  0x27   :  { %2953 = vst [vmem:[#allocation14_spill] sm:$0xff] %v2208_v13  ;;  %v433_v4 = vld [vmem:[%s2939_s0 + $0x2f0] sm:$0xff]  ;;  %v434_v3 = vld [vmem:[%s2939_s0 + $0x2f8] sm:$0xff]  ;;  %v435_v2 = vld [vmem:[%s2939_s0 + $0x300] sm:$0xff]  ;;  %v2230_v22 = vsub.f32 %v419_v6, %v547_v34  ;;  %v2232_v23 = vsub.f32 %v420_v7, %v548_v35 }
  0x28   :  { %v549_v51 = vld [vmem:[%s2940_s1 + $0x290] sm:$0xff]  ;;  %v550_v52 = vld [vmem:[%s2940_s1 + $0x298] sm:$0xff]  ;;  %v551_v53 = vld [vmem:[%s2940_s1 + $0x2a0] sm:$0xff]  ;;  %2954 = vst [vmem:[#allocation15_spill] sm:$0xff] %v2228_v21 }
  0x29   :  { %2955 = vst [vmem:[#allocation16_spill] sm:$0xff] %v2230_v22  ;;  %2956 = vst [vmem:[#allocation17_spill] sm:$0xff] %v2232_v23  ;;  %v436_v13 = vld [vmem:[%s2939_s0 + $0x308] sm:$0xff]  ;;  %v437_v12 = vld [vmem:[%s2939_s0 + $0x310] sm:$0xff]  ;;  %v2252_v33 = vsub.f32 %v421_v24, %v549_v51  ;;  %v2254_v34 = vsub.f32 %v422_v25, %v550_v52  ;;  %v2256_v35 = vsub.f32 %v423_v26, %v551_v53 }
  0x2a   :  { %v438_v11 = vld [vmem:[%s2939_s0 + $0x318] sm:$0xff]  ;;  %v552_v5 = vld [vmem:[%s2940_s1 + $0x2a8] sm:$0xff]  ;;  %v553_v6 = vld [vmem:[%s2940_s1 + $0x2b0] sm:$0xff] }
  0x2b   :  { %v554_v7 = vld [vmem:[%s2940_s1 + $0x2b8] sm:$0xff]  ;;  %2957 = vst [vmem:[#allocation18_spill] sm:$0xff] %v2252_v33  ;;  %2958 = vst [vmem:[#allocation19_spill] sm:$0xff] %v2254_v34  ;;  %v439_v23 = vld [vmem:[%s2939_s0 + $0x320] sm:$0xff]  ;;  %v2276_v51 = vsub.f32 %v424_v48, %v552_v5  ;;  %v2278_v52 = vsub.f32 %v425_v49, %v553_v6 }
  0x2c   :  { %2959 = vst [vmem:[#allocation20_spill] sm:$0xff] %v2256_v35  ;;  %v440_v22 = vld [vmem:[%s2939_s0 + $0x328] sm:$0xff]  ;;  %v441_v21 = vld [vmem:[%s2939_s0 + $0x330] sm:$0xff]  ;;  %v555_v24 = vld [vmem:[%s2940_s1 + $0x2c0] sm:$0xff]  ;;  %v2280_v53 = vsub.f32 %v426_v50, %v554_v7 }
  0x2d   :  { %v556_v25 = vld [vmem:[%s2940_s1 + $0x2c8] sm:$0xff]  ;;  %v557_v26 = vld [vmem:[%s2940_s1 + $0x2d0] sm:$0xff]  ;;  %2960 = vst [vmem:[#allocation21_spill] sm:$0xff] %v2276_v51  ;;  %2961 = vst [vmem:[#allocation22_spill] sm:$0xff] %v2278_v52  ;;  %v2300_v5 = vsub.f32 %v427_v41, %v555_v24 }
  0x2e   :  { %2962 = vst [vmem:[#allocation23_spill] sm:$0xff] %v2280_v53  ;;  %v442_v35 = vld [vmem:[%s2939_s0 + $0x338] sm:$0xff]  ;;  %v443_v34 = vld [vmem:[%s2939_s0 + $0x340] sm:$0xff]  ;;  %v444_v33 = vld [vmem:[%s2939_s0 + $0x348] sm:$0xff]  ;;  %v2302_v6 = vsub.f32 %v428_v40, %v556_v25  ;;  %v2304_v7 = vsub.f32 %v429_v39, %v557_v26 }
  0x2f   :  { %v558_v48 = vld [vmem:[%s2940_s1 + $0x2d8] sm:$0xff]  ;;  %v559_v49 = vld [vmem:[%s2940_s1 + $0x2e0] sm:$0xff]  ;;  %v560_v50 = vld [vmem:[%s2940_s1 + $0x2e8] sm:$0xff]  ;;  %2963 = vst [vmem:[#allocation24_spill] sm:$0xff] %v2300_v5 }
  0x30   :  { %2964 = vst [vmem:[#allocation25_spill] sm:$0xff] %v2302_v6  ;;  %2965 = vst [vmem:[#allocation26_spill] sm:$0xff] %v2304_v7  ;;  %v445_v53 = vld [vmem:[%s2939_s0 + $0x350] sm:$0xff]  ;;  %v446_v52 = vld [vmem:[%s2939_s0 + $0x358] sm:$0xff]  ;;  %v2324_v24 = vsub.f32 %v430_v59, %v558_v48  ;;  %v2326_v25 = vsub.f32 %v431_v58, %v559_v49  ;;  %v2328_v26 = vsub.f32 %v432_v57, %v560_v50 }
  0x31   :  { %v447_v51 = vld [vmem:[%s2939_s0 + $0x360] sm:$0xff]  ;;  %v561_v41 = vld [vmem:[%s2940_s1 + $0x2f0] sm:$0xff]  ;;  %v562_v39 = vld [vmem:[%s2940_s1 + $0x2f8] sm:$0xff] }
  0x32   :  { %v563_v40 = vld [vmem:[%s2940_s1 + $0x300] sm:$0xff]  ;;  %2966 = vst [vmem:[#allocation27_spill] sm:$0xff] %v2324_v24  ;;  %2967 = vst [vmem:[#allocation28_spill] sm:$0xff] %v2326_v25  ;;  %v448_v7 = vld [vmem:[%s2939_s0 + $0x368] sm:$0xff]  ;;  %v2348_v48 = vsub.f32 %v433_v4, %v561_v41  ;;  %v2350_v49 = vsub.f32 %v434_v3, %v562_v39 }
  0x33   :  { %2968 = vst [vmem:[#allocation29_spill] sm:$0xff] %v2328_v26  ;;  %v449_v6 = vld [vmem:[%s2939_s0 + $0x370] sm:$0xff]  ;;  %v450_v5 = vld [vmem:[%s2939_s0 + $0x378] sm:$0xff]  ;;  %v564_v59 = vld [vmem:[%s2940_s1 + $0x308] sm:$0xff]  ;;  %v2352_v50 = vsub.f32 %v435_v2, %v563_v40 }
  0x34   :  { %v565_v57 = vld [vmem:[%s2940_s1 + $0x310] sm:$0xff]  ;;  %v566_v58 = vld [vmem:[%s2940_s1 + $0x318] sm:$0xff]  ;;  %2969 = vst [vmem:[#allocation30_spill] sm:$0xff] %v2348_v48  ;;  %2970 = vst [vmem:[#allocation31_spill] sm:$0xff] %v2350_v49  ;;  %v2372_v41 = vsub.f32 %v436_v13, %v564_v59 }
  0x35   :  { %2971 = vst [vmem:[#allocation32_spill] sm:$0xff] %v2352_v50  ;;  %v451_v26 = vld [vmem:[%s2939_s0 + $0x380] sm:$0xff]  ;;  %v452_v25 = vld [vmem:[%s2939_s0 + $0x388] sm:$0xff]  ;;  %v453_v24 = vld [vmem:[%s2939_s0 + $0x390] sm:$0xff]  ;;  %v2374_v39 = vsub.f32 %v437_v12, %v565_v57  ;;  %v2376_v40 = vsub.f32 %v438_v11, %v566_v58 }
  0x36   :  { %v567_v4 = vld [vmem:[%s2940_s1 + $0x320] sm:$0xff]  ;;  %v568_v2 = vld [vmem:[%s2940_s1 + $0x328] sm:$0xff]  ;;  %v569_v3 = vld [vmem:[%s2940_s1 + $0x330] sm:$0xff]  ;;  %2972 = vst [vmem:[#allocation33_spill] sm:$0xff] %v2372_v41 }
  0x37   :  { %2973 = vst [vmem:[#allocation34_spill] sm:$0xff] %v2374_v39  ;;  %2974 = vst [vmem:[#allocation35_spill] sm:$0xff] %v2376_v40  ;;  %v454_v50 = vld [vmem:[%s2939_s0 + $0x398] sm:$0xff]  ;;  %v455_v49 = vld [vmem:[%s2939_s0 + $0x3a0] sm:$0xff]  ;;  %v2396_v59 = vsub.f32 %v439_v23, %v567_v4  ;;  %v2398_v57 = vsub.f32 %v440_v22, %v568_v2  ;;  %v2400_v58 = vsub.f32 %v441_v21, %v569_v3 }
  0x38   :  { %v456_v48 = vld [vmem:[%s2939_s0 + $0x3a8] sm:$0xff]  ;;  %v570_v13 = vld [vmem:[%s2940_s1 + $0x338] sm:$0xff]  ;;  %v571_v11 = vld [vmem:[%s2940_s1 + $0x340] sm:$0xff] }
  0x39   :  { %v572_v12 = vld [vmem:[%s2940_s1 + $0x348] sm:$0xff]  ;;  %2975 = vst [vmem:[#allocation36_spill] sm:$0xff] %v2396_v59  ;;  %2976 = vst [vmem:[#allocation37_spill] sm:$0xff] %v2398_v57  ;;  %v457_v40 = vld [vmem:[%s2939_s0 + $0x3b0] sm:$0xff]  ;;  %v2420_v4 = vsub.f32 %v442_v35, %v570_v13  ;;  %v2422_v2 = vsub.f32 %v443_v34, %v571_v11 }
  0x3a   :  { %2977 = vst [vmem:[#allocation38_spill] sm:$0xff] %v2400_v58  ;;  %v458_v39 = vld [vmem:[%s2939_s0 + $0x3b8] sm:$0xff]  ;;  %v459_v41 = vld [vmem:[%s2939_s0 + $0x3c0] sm:$0xff]  ;;  %v573_v23 = vld [vmem:[%s2940_s1 + $0x350] sm:$0xff]  ;;  %v2424_v3 = vsub.f32 %v444_v33, %v572_v12 }
  0x3b   :  { %v574_v21 = vld [vmem:[%s2940_s1 + $0x358] sm:$0xff]  ;;  %v575_v22 = vld [vmem:[%s2940_s1 + $0x360] sm:$0xff]  ;;  %2978 = vst [vmem:[#allocation39_spill] sm:$0xff] %v2420_v4  ;;  %2979 = vst [vmem:[#allocation40_spill] sm:$0xff] %v2422_v2  ;;  %v2444_v13 = vsub.f32 %v445_v53, %v573_v23 }
  0x3c   :  { %2980 = vst [vmem:[#allocation41_spill] sm:$0xff] %v2424_v3  ;;  %v460_v58 = vld [vmem:[%s2939_s0 + $0x3c8] sm:$0xff]  ;;  %v461_v57 = vld [vmem:[%s2939_s0 + $0x3d0] sm:$0xff]  ;;  %v462_v59 = vld [vmem:[%s2939_s0 + $0x3d8] sm:$0xff]  ;;  %v2446_v11 = vsub.f32 %v446_v52, %v574_v21  ;;  %v2448_v12 = vsub.f32 %v447_v51, %v575_v22 }
  0x3d   :  { %v576_v35 = vld [vmem:[%s2940_s1 + $0x368] sm:$0xff]  ;;  %v577_v33 = vld [vmem:[%s2940_s1 + $0x370] sm:$0xff]  ;;  %v578_v34 = vld [vmem:[%s2940_s1 + $0x378] sm:$0xff]  ;;  %2981 = vst [vmem:[#allocation42_spill] sm:$0xff] %v2444_v13 }
  0x3e   :  { %2982 = vst [vmem:[#allocation43_spill] sm:$0xff] %v2446_v11  ;;  %2983 = vst [vmem:[#allocation44_spill] sm:$0xff] %v2448_v12  ;;  %v463_v3 = vld [vmem:[%s2939_s0 + $0x3e0] sm:$0xff]  ;;  %v464_v2 = vld [vmem:[%s2939_s0 + $0x3e8] sm:$0xff]  ;;  %v2468_v23 = vsub.f32 %v448_v7, %v576_v35  ;;  %v2470_v21 = vsub.f32 %v449_v6, %v577_v33  ;;  %v2472_v22 = vsub.f32 %v450_v5, %v578_v34 }
  0x3f   :  { %v465_v4 = vld [vmem:[%s2939_s0 + $0x3f0] sm:$0xff]  ;;  %v579_v53 = vld [vmem:[%s2940_s1 + $0x380] sm:$0xff]  ;;  %v580_v51 = vld [vmem:[%s2940_s1 + $0x388] sm:$0xff] }
  0x40   :  { %v581_v52 = vld [vmem:[%s2940_s1 + $0x390] sm:$0xff]  ;;  %2984 = vst [vmem:[#allocation45_spill] sm:$0xff] %v2470_v21  ;;  %2985 = vst [vmem:[#allocation46_spill] sm:$0xff] %v2472_v22  ;;  %v466_v12 = vld [vmem:[%s2939_s0 + $0x3f8] sm:$0xff]  ;;  %v2486_v6 = vsub.f32 %v451_v26, %v579_v53  ;;  %v2488_v5 = vsub.f32 %v452_v25, %v580_v51 }
  0x41   :  { %v582_v11 = vld [vmem:[%s2940_s1 + $0x398] sm:$0xff]  ;;  %v583_v13 = vld [vmem:[%s2940_s1 + $0x3a0] sm:$0xff]  ;;  %v584_v7 = vld [vmem:[%s2940_s1 + $0x3a8] sm:$0xff]  ;;  %v2490_v35 = vsub.f32 %v453_v24, %v581_v52 }
  0x42   :  { %v585_v33 = vld [vmem:[%s2940_s1 + $0x3b0] sm:$0xff]  ;;  %v586_v34 = vld [vmem:[%s2940_s1 + $0x3b8] sm:$0xff]  ;;  %v587_v22 = vld [vmem:[%s2940_s1 + $0x3c0] sm:$0xff]  ;;  %v2501_v21 = vsub.f32 %v454_v50, %v582_v11  ;;  %v2503_v26 = vsub.f32 %v455_v49, %v583_v13  ;;  %v2505_v25 = vsub.f32 %v456_v48, %v584_v7 }
  0x43   :  { %v588_v24 = vld [vmem:[%s2940_s1 + $0x3c8] sm:$0xff]  ;;  %v589_v53 = vld [vmem:[%s2940_s1 + $0x3d0] sm:$0xff]  ;;  %v590_v51 = vld [vmem:[%s2940_s1 + $0x3d8] sm:$0xff]  ;;  %v2516_v52 = vsub.f32 %v457_v40, %v585_v33  ;;  %v2518_v50 = vsub.f32 %v458_v39, %v586_v34  ;;  %v2520_v49 = vsub.f32 %v459_v41, %v587_v22 }
  0x44   :  { %v591_v48 = vld [vmem:[%s2940_s1 + $0x3e0] sm:$0xff]  ;;  %v592_v13 = vld [vmem:[%s2940_s1 + $0x3e8] sm:$0xff]  ;;  %v593_v11 = vld [vmem:[%s2940_s1 + $0x3f0] sm:$0xff]  ;;  %v2531_v7 = vsub.f32 %v460_v58, %v588_v24  ;;  %v2533_v40 = vsub.f32 %v461_v57, %v589_v53  ;;  %v2535_v39 = vsub.f32 %v462_v59, %v590_v51 }
  0x45   :  { %2986 = vst [vmem:[#allocation47_spill] sm:$0xff] %v2516_v52  ;;  %2987 = vst [vmem:[#allocation48_spill] sm:$0xff] %v2518_v50  ;;  %v594_v41 = vld [vmem:[%s2940_s1 + $0x3f8] sm:$0xff]  ;;  %v2540_v22 = vsub.f32 %v463_v3, %v591_v48  ;;  %v2542_v33 = vsub.f32 %v464_v2, %v592_v13  ;;  %v2544_v34 = vsub.f32 %v465_v4, %v593_v11  ;;  %v339_v58 = vld [vmem:[%s2939_s0] sm:$0xff] }
  0x46   :  { %2988 = vst [vmem:[#allocation49_spill] sm:$0xff] %v2520_v49  ;;  %2989 = vst [vmem:[#allocation50_spill] sm:$0xff] %v2531_v7  ;;  %v2546_v49 = vsub.f32 %v466_v12, %v594_v41  ;;  %v340_v59 = vld [vmem:[%s2939_s0 + $0x8] sm:$0xff]  ;;  %v467_v57 = vld [vmem:[%s2940_s1] sm:$0xff] }
  0x47   :  { %2990 = vst [vmem:[#allocation51_spill] sm:$0xff] %v2533_v40  ;;  %2991 = vst [vmem:[#allocation52_spill] sm:$0xff] %v2535_v39  ;;  %v468_v2 = vld [vmem:[%s2940_s1 + $0x8] sm:$0xff]  ;;  %v341_v4 = vld [vmem:[%s2939_s0 + $0x10] sm:$0xff]  ;;  %v595_v12 = vsub.f32 %v339_v58, %v467_v57 }
  0x48   :  { %2992 = vst [vmem:[#allocation53_spill] sm:$0xff] %v2540_v22  ;;  %2993 = vst [vmem:[#allocation54_spill] sm:$0xff] %v2542_v33  ;;  %v469_v3 = vld [vmem:[%s2940_s1 + $0x10] sm:$0xff]  ;;  %v596_v24 = vsub.f32 %v340_v59, %v468_v2  ;;  %v342_v53 = vld [vmem:[%s2939_s0 + $0x18] sm:$0xff] }
  0x49   :  { %2994 = vst [vmem:[#allocation55_spill] sm:$0xff] %v2544_v34  ;;  %2995 = vst [vmem:[#allocation56_spill] sm:$0xff] %v2546_v49  ;;  %v470_v51 = vld [vmem:[%s2940_s1 + $0x18] sm:$0xff]  ;;  %v597_v48 = vsub.f32 %v341_v4, %v469_v3  ;;  %v343_v13 = vld [vmem:[%s2939_s0 + $0x20] sm:$0xff]  ;;  %v980_v58 = vmul.f32 %v595_v12, %v595_v12 }
  0x4a   :  { %v471_v11 = vld [vmem:[%s2940_s1 + $0x20] sm:$0xff]  ;;  %v598_v41 = vsub.f32 %v342_v53, %v470_v51  ;;  %v981_v59 = vmul.f32 %v596_v24, %v596_v24  ;;  %v344_v57 = vld [vmem:[%s2939_s0 + $0x28] sm:$0xff]  ;;  %v345_v49 = vld [vmem:[%s2939_s0 + $0x30] sm:$0xff] }
  0x4b   :  { %v472_v2 = vld [vmem:[%s2940_s1 + $0x28] sm:$0xff]  ;;  %v599_v4 = vsub.f32 %v343_v13, %v471_v11  ;;  %v982_v3 = vmul.f32 %v597_v48, %v597_v48  ;;  %v473_v53 = vld [vmem:[%s2940_s1 + $0x30] sm:$0xff]  ;;  %v346_v34 = vld [vmem:[%s2939_s0 + $0x38] sm:$0xff] }
  0x4c   :  { %v600_v12 = vsub.f32 %v344_v57, %v472_v2  ;;  %v983_v24 = vmul.f32 %v598_v41, %v598_v41  ;;  %v1623_v51 = vadd.f32 %v981_v59, %v980_v58  ;;  %v474_v13 = vld [vmem:[%s2940_s1 + $0x38] sm:$0xff]  ;;  %v601_v48 = vsub.f32 %v345_v49, %v473_v53  ;;  %v347_v22 = vld [vmem:[%s2939_s0 + $0x40] sm:$0xff]  ;;  %v348_v2 = vld [vmem:[%s2939_s0 + $0x48] sm:$0xff] }
  0x4d   :  { %v984_v11 = vmul.f32 %v599_v4, %v599_v4  ;;  %v475_v41 = vld [vmem:[%s2940_s1 + $0x40] sm:$0xff]  ;;  %v602_v58 = vsub.f32 %v346_v34, %v474_v13  ;;  %v476_v49 = vld [vmem:[%s2940_s1 + $0x48] sm:$0xff]  ;;  %v477_v34 = vld [vmem:[%s2940_s1 + $0x50] sm:$0xff] }
  0x4e   :  { %v1624_v33 = vadd.f32 %v1623_v51, %v982_v3  ;;  %v985_v59 = vmul.f32 %v600_v12, %v600_v12  ;;  %v603_v4 = vsub.f32 %v347_v22, %v475_v41  ;;  %v986_v3 = vmul.f32 %v601_v48, %v601_v48  ;;  %v349_v51 = vld [vmem:[%s2939_s0 + $0x50] sm:$0xff]  ;;  %v350_v13 = vld [vmem:[%s2939_s0 + $0x58] sm:$0xff] }
  0x4f   :  { %v987_v12 = vmul.f32 %v602_v58, %v602_v58  ;;  %v478_v22 = vld [vmem:[%s2940_s1 + $0x58] sm:$0xff]  ;;  %v605_v48 = vsub.f32 %v349_v51, %v477_v34  ;;  %v479_v58 = vld [vmem:[%s2940_s1 + $0x60] sm:$0xff] }
  0x50   :  { %v1625_v57 = vadd.f32 %v1624_v33, %v983_v24  ;;  %v604_v33 = vsub.f32 %v348_v2, %v476_v49 }
  0x51   :  { %v990_v51 = vmul.f32 %v605_v48, %v605_v48  ;;  %v482_v48 = vld [vmem:[%s2940_s1 + $0x78] sm:$0xff] }
  0x52   :  { %v1626_v53 = vadd.f32 %v1625_v57, %v984_v11  ;;  %v988_v11 = vmul.f32 %v603_v4, %v603_v4  ;;  %v351_v57 = vld [vmem:[%s2939_s0 + $0x60] sm:$0xff]  ;;  %v989_v2 = vmul.f32 %v604_v33, %v604_v33  ;;  %v480_v4 = vld [vmem:[%s2940_s1 + $0x68] sm:$0xff]  ;;  %v481_v33 = vld [vmem:[%s2940_s1 + $0x70] sm:$0xff] }
  0x54   :  { %v1627_v24 = vadd.f32 %v1626_v53, %v985_v59  ;;  %v606_v59 = vsub.f32 %v350_v13, %v478_v22  ;;  %v352_v53 = vld [vmem:[%s2939_s0 + $0x68] sm:$0xff] }
  0x56   :  { %v1628_v41 = vadd.f32 %v1627_v24, %v986_v3  ;;  %v607_v3 = vsub.f32 %v351_v57, %v479_v58  ;;  %v353_v24 = vld [vmem:[%s2939_s0 + $0x70] sm:$0xff]  ;;  %v991_v13 = vmul.f32 %v606_v59, %v606_v59  ;;  %v483_v59 = vld [vmem:[%s2940_s1 + $0x80] sm:$0xff] }
  0x58   :  { %v1629_v49 = vadd.f32 %v1628_v41, %v987_v12  ;;  %v608_v12 = vsub.f32 %v352_v53, %v480_v4  ;;  %v354_v41 = vld [vmem:[%s2939_s0 + $0x78] sm:$0xff]  ;;  %v992_v57 = vmul.f32 %v607_v3, %v607_v3  ;;  %v484_v3 = vld [vmem:[%s2940_s1 + $0x88] sm:$0xff] }
  0x5a   :  { %v1630_v34 = vadd.f32 %v1629_v49, %v988_v11  ;;  %v609_v11 = vsub.f32 %v353_v24, %v481_v33  ;;  %v355_v49 = vld [vmem:[%s2939_s0 + $0x80] sm:$0xff]  ;;  %v993_v53 = vmul.f32 %v608_v12, %v608_v12  ;;  %v485_v12 = vld [vmem:[%s2940_s1 + $0x90] sm:$0xff] }
  0x5c   :  { %v1631_v22 = vadd.f32 %v1630_v34, %v989_v2  ;;  %v610_v2 = vsub.f32 %v354_v41, %v482_v48  ;;  %v356_v34 = vld [vmem:[%s2939_s0 + $0x88] sm:$0xff]  ;;  %v994_v24 = vmul.f32 %v609_v11, %v609_v11  ;;  %v486_v11 = vld [vmem:[%s2940_s1 + $0x98] sm:$0xff] }
  0x5e   :  { %v1632_v58 = vadd.f32 %v1631_v22, %v990_v51  ;;  %v611_v51 = vsub.f32 %v355_v49, %v483_v59  ;;  %v357_v22 = vld [vmem:[%s2939_s0 + $0x90] sm:$0xff]  ;;  %v995_v41 = vmul.f32 %v610_v2, %v610_v2  ;;  %v487_v2 = vld [vmem:[%s2940_s1 + $0xa0] sm:$0xff] }
  0x60   :  { %v1633_v4 = vadd.f32 %v1632_v58, %v991_v13  ;;  %v612_v13 = vsub.f32 %v356_v34, %v484_v3  ;;  %v358_v58 = vld [vmem:[%s2939_s0 + $0x98] sm:$0xff]  ;;  %v996_v49 = vmul.f32 %v611_v51, %v611_v51  ;;  %v488_v51 = vld [vmem:[%s2940_s1 + $0xa8] sm:$0xff] }
  0x62   :  { %v1634_v33 = vadd.f32 %v1633_v4, %v992_v57  ;;  %v613_v57 = vsub.f32 %v357_v22, %v485_v12  ;;  %v359_v4 = vld [vmem:[%s2939_s0 + $0xa0] sm:$0xff]  ;;  %v997_v34 = vmul.f32 %v612_v13, %v612_v13  ;;  %v489_v13 = vld [vmem:[%s2940_s1 + $0xb0] sm:$0xff] }
  0x64   :  { %v1635_v48 = vadd.f32 %v1634_v33, %v993_v53  ;;  %v614_v53 = vsub.f32 %v358_v58, %v486_v11  ;;  %v360_v33 = vld [vmem:[%s2939_s0 + $0xa8] sm:$0xff]  ;;  %v998_v22 = vmul.f32 %v613_v57, %v613_v57  ;;  %v490_v57 = vld [vmem:[%s2940_s1 + $0xb8] sm:$0xff] }
  0x66   :  { %v1636_v59 = vadd.f32 %v1635_v48, %v994_v24  ;;  %v615_v24 = vsub.f32 %v359_v4, %v487_v2  ;;  %v361_v48 = vld [vmem:[%s2939_s0 + $0xb0] sm:$0xff]  ;;  %v999_v58 = vmul.f32 %v614_v53, %v614_v53  ;;  %v491_v53 = vld [vmem:[%s2940_s1 + $0xc0] sm:$0xff] }
  0x68   :  { %v1637_v3 = vadd.f32 %v1636_v59, %v995_v41  ;;  %v616_v41 = vsub.f32 %v360_v33, %v488_v51  ;;  %v362_v59 = vld [vmem:[%s2939_s0 + $0xb8] sm:$0xff]  ;;  %v1000_v4 = vmul.f32 %v615_v24, %v615_v24  ;;  %v492_v24 = vld [vmem:[%s2940_s1 + $0xc8] sm:$0xff] }
  0x6a   :  { %v1638_v12 = vadd.f32 %v1637_v3, %v996_v49  ;;  %v617_v49 = vsub.f32 %v361_v48, %v489_v13  ;;  %v363_v3 = vld [vmem:[%s2939_s0 + $0xc0] sm:$0xff]  ;;  %v1001_v33 = vmul.f32 %v616_v41, %v616_v41  ;;  %v493_v41 = vld [vmem:[%s2940_s1 + $0xd0] sm:$0xff] }
  0x6c   :  { %v1639_v11 = vadd.f32 %v1638_v12, %v997_v34  ;;  %v618_v34 = vsub.f32 %v362_v59, %v490_v57  ;;  %v364_v12 = vld [vmem:[%s2939_s0 + $0xc8] sm:$0xff]  ;;  %v1002_v48 = vmul.f32 %v617_v49, %v617_v49  ;;  %v494_v49 = vld [vmem:[%s2940_s1 + $0xd8] sm:$0xff] }
  0x6e   :  { %v1640_v2 = vadd.f32 %v1639_v11, %v998_v22  ;;  %v619_v22 = vsub.f32 %v363_v3, %v491_v53  ;;  %v365_v11 = vld [vmem:[%s2939_s0 + $0xd0] sm:$0xff]  ;;  %v1003_v59 = vmul.f32 %v618_v34, %v618_v34  ;;  %v495_v34 = vld [vmem:[%s2940_s1 + $0xe0] sm:$0xff] }
  0x70   :  { %v1641_v51 = vadd.f32 %v1640_v2, %v999_v58  ;;  %v620_v58 = vsub.f32 %v364_v12, %v492_v24  ;;  %v366_v2 = vld [vmem:[%s2939_s0 + $0xd8] sm:$0xff]  ;;  %v1004_v3 = vmul.f32 %v619_v22, %v619_v22  ;;  %v496_v22 = vld [vmem:[%s2940_s1 + $0xe8] sm:$0xff] }
  0x72   :  { %v1642_v13 = vadd.f32 %v1641_v51, %v1000_v4  ;;  %v621_v4 = vsub.f32 %v365_v11, %v493_v41  ;;  %v367_v51 = vld [vmem:[%s2939_s0 + $0xe0] sm:$0xff]  ;;  %v1005_v12 = vmul.f32 %v620_v58, %v620_v58  ;;  %v497_v58 = vld [vmem:[%s2940_s1 + $0xf0] sm:$0xff] }
  0x74   :  { %v1643_v57 = vadd.f32 %v1642_v13, %v1001_v33  ;;  %v622_v33 = vsub.f32 %v366_v2, %v494_v49  ;;  %v368_v13 = vld [vmem:[%s2939_s0 + $0xe8] sm:$0xff]  ;;  %v1006_v11 = vmul.f32 %v621_v4, %v621_v4  ;;  %v498_v4 = vld [vmem:[%s2940_s1 + $0xf8] sm:$0xff] }
  0x76   :  { %v1644_v53 = vadd.f32 %v1643_v57, %v1002_v48  ;;  %v623_v48 = vsub.f32 %v367_v51, %v495_v34  ;;  %v369_v57 = vld [vmem:[%s2939_s0 + $0xf0] sm:$0xff]  ;;  %v1007_v2 = vmul.f32 %v622_v33, %v622_v33  ;;  %v499_v33 = vld [vmem:[%s2940_s1 + $0x100] sm:$0xff] }
  0x78   :  { %v1645_v24 = vadd.f32 %v1644_v53, %v1003_v59  ;;  %v624_v59 = vsub.f32 %v368_v13, %v496_v22  ;;  %v370_v53 = vld [vmem:[%s2939_s0 + $0xf8] sm:$0xff]  ;;  %v1008_v51 = vmul.f32 %v623_v48, %v623_v48  ;;  %v1013_v48 = vmul.f32 %v1848_v20, %v1848_v20 }
  0x79   :  { %v1018_v20 = vmul.f32 %v1894_v37, %v1894_v37  ;;  %v1023_v37 = vmul.f32 %v1940_v54, %v1940_v54  ;;  %v1028_v54 = vmul.f32 %v1968_v1, %v1968_v1  ;;  %v1033_v1 = vmul.f32 %v2014_v18, %v2014_v18 }
  0x7a   :  { %v1646_v41 = vadd.f32 %v1645_v24, %v1004_v3  ;;  %v625_v3 = vsub.f32 %v369_v57, %v497_v58  ;;  %v371_v24 = vld [vmem:[%s2939_s0 + $0x100] sm:$0xff]  ;;  %v1009_v13 = vmul.f32 %v624_v59, %v624_v59  ;;  %v1014_v58 = vmul.f32 %v1868_v27, %v1868_v27 }
  0x7b   :  { %v1019_v27 = vmul.f32 %v1896_v38, %v1896_v38  ;;  %v1024_v38 = vmul.f32 %v1942_v55, %v1942_v55  ;;  %v1029_v55 = vmul.f32 %v1988_v8, %v1988_v8  ;;  %v1034_v8 = vmul.f32 %v2016_v19, %v2016_v19 }
  0x7c   :  { %v1647_v49 = vadd.f32 %v1646_v41, %v1005_v12  ;;  %v626_v12 = vsub.f32 %v370_v53, %v498_v4  ;;  %v627_v41 = vsub.f32 %v371_v24, %v499_v33  ;;  %v1010_v39 = vmul.f32 %v625_v3, %v625_v3 }
  0x7d   :  { %v1015_v53 = vmul.f32 %v1870_v28, %v1870_v28  ;;  %v1020_v28 = vmul.f32 %v1916_v45, %v1916_v45  ;;  %v1025_v45 = vmul.f32 %v1944_v56, %v1944_v56  ;;  %v1030_v56 = vmul.f32 %v1990_v9, %v1990_v9 }
  0x7e   :  { %v1648_v34 = vadd.f32 %v1647_v49, %v1006_v11  ;;  %v1011_v7 = vmul.f32 %v626_v12, %v626_v12  ;;  %v1012_v52 = vmul.f32 %v627_v41, %v627_v41  ;;  %v1035_v9 = vmul.f32 %v2036_v30, %v2036_v30 }
  0x7f   :  { %v1038_v18 = vmul.f32 %v2060_v42, %v2060_v42  ;;  %v1039_v19 = vmul.f32 %v2062_v43, %v2062_v43  ;;  %v1040_v30 = vmul.f32 %v2064_v44, %v2064_v44  ;;  %v1043_v42 = vmul.f32 %v2088_v62, %v2088_v62 }
  0x80   :  { %v1649_v22 = vadd.f32 %v1648_v34, %v1007_v2  ;;  %v1016_v2 = vmul.f32 %v1872_v29, %v1872_v29  ;;  %v1021_v29 = vmul.f32 %v1918_v46, %v1918_v46  ;;  %v1026_v46 = vmul.f32 %v1964_v63, %v1964_v63 }
  0x81   :  { %v1031_v63 = vmul.f32 %v1992_v10, %v1992_v10  ;;  %v1036_v10 = vmul.f32 %v2038_v31, %v2038_v31  ;;  %v1041_v31 = vmul.f32 %v2084_v60, %v2084_v60  ;;  %v1044_v43 = vmul.f32 %v2108_v14, %v2108_v14 }
  0x82   :  { %v1650_v40 = vadd.f32 %v1649_v22, %v1008_v51  ;;  %v1045_v44 = vmul.f32 %v2110_v15, %v2110_v15  ;;  %v1046_v60 = vmul.f32 %v2112_v16, %v2112_v16 }
  0x84   :  { %v1651_v50 = vadd.f32 %v1650_v40, %v1009_v13  ;;  %v1017_v40 = vmul.f32 %v1892_v36, %v1892_v36  ;;  %v1022_v36 = vmul.f32 %v1920_v47, %v1920_v47  ;;  %v1027_v47 = vmul.f32 %v1966_v0, %v1966_v0 }
  0x85   :  { %v1032_v0 = vmul.f32 %v2012_v17, %v2012_v17  ;;  %v1037_v17 = vmul.f32 %v2040_v32, %v2040_v32  ;;  %v1042_v32 = vmul.f32 %v2086_v61, %v2086_v61 }
  0x86   :  { %v1652_v57 = vadd.f32 %v1651_v50, %v1010_v39 }
  0x88   :  { %v1653_v11 = vadd.f32 %v1652_v57, %v1011_v7 }
  0x8a   :  { %v1654_v49 = vadd.f32 %v1653_v11, %v1012_v52 }
  0x8c   :  { %v1655_v59 = vadd.f32 %v1654_v49, %v1013_v48 }
  0x8e   :  { %v1656_v4 = vadd.f32 %v1655_v59, %v1014_v58 }
  0x90   :  { %v1657_v50 = vadd.f32 %v1656_v4, %v1015_v53 }
  0x92   :  { %v1658_v7 = vadd.f32 %v1657_v50, %v1016_v2 }
  0x94   :  { %v1659_v52 = vadd.f32 %v1658_v7, %v1017_v40 }
  0x96   :  { %v1660_v39 = vadd.f32 %v1659_v52, %v1018_v20 }
  0x98   :  { %v1661_v3 = vadd.f32 %v1660_v39, %v1019_v27 }
  0x9a   :  { %v1662_v51 = vadd.f32 %v1661_v3, %v1020_v28 }
  0x9c   :  { %v1663_v34 = vadd.f32 %v1662_v51, %v1021_v29  ;;  %v2996_v29 = vld [vmem:[#allocation3_spill] sm:$0xff] }
  0x9d   :  { %v1047_v61 = vmul.f32 %v2996_v29, %v2996_v29  ;;  %v3015_v29 = vld [vmem:[#allocation22_spill] sm:$0xff] }
  0x9e   :  { %v1664_v24 = vadd.f32 %v1663_v34, %v1022_v36  ;;  %v2997_v36 = vld [vmem:[#allocation4_spill] sm:$0xff] }
  0x9f   :  { %v1048_v62 = vmul.f32 %v2997_v36, %v2997_v36  ;;  %v3016_v36 = vld [vmem:[#allocation23_spill] sm:$0xff] }
  0xa0   :  { %v1665_v33 = vadd.f32 %v1664_v24, %v1023_v37  ;;  %v2998_v37 = vld [vmem:[#allocation5_spill] sm:$0xff] }
  0xa1   :  { %v1049_v14 = vmul.f32 %v2998_v37, %v2998_v37  ;;  %v3017_v37 = vld [vmem:[#allocation24_spill] sm:$0xff] }
  0xa2   :  { %v1666_v12 = vadd.f32 %v1665_v33, %v1024_v38  ;;  %v2999_v38 = vld [vmem:[#allocation6_spill] sm:$0xff] }
  0xa3   :  { %v1050_v15 = vmul.f32 %v2999_v38, %v2999_v38  ;;  %v3018_v38 = vld [vmem:[#allocation25_spill] sm:$0xff] }
  0xa4   :  { %v1667_v13 = vadd.f32 %v1666_v12, %v1025_v45  ;;  %v3000_v45 = vld [vmem:[#allocation7_spill] sm:$0xff] }
  0xa5   :  { %v1051_v16 = vmul.f32 %v3000_v45, %v3000_v45  ;;  %v3019_v45 = vld [vmem:[#allocation26_spill] sm:$0xff] }
  0xa6   :  { %v1668_v22 = vadd.f32 %v1667_v13, %v1026_v46  ;;  %v3001_v46 = vld [vmem:[#allocation8_spill] sm:$0xff]  ;;  %v3002_v13 = vld [vmem:[#allocation9_spill] sm:$0xff] }
  0xa7   :  { %v1052_v12 = vmul.f32 %v3001_v46, %v3001_v46  ;;  %v3020_v46 = vld [vmem:[#allocation27_spill] sm:$0xff] }
  0xa8   :  { %v1669_v41 = vadd.f32 %v1668_v22, %v1027_v47 }
  0xaa   :  { %v1670_v57 = vadd.f32 %v1669_v41, %v1028_v54  ;;  %v1053_v54 = vmul.f32 %v3002_v13, %v3002_v13  ;;  %v3021_v13 = vld [vmem:[#allocation28_spill] sm:$0xff] }
  0xac   :  { %v1671_v48 = vadd.f32 %v1670_v57, %v1029_v55  ;;  %v3003_v55 = vld [vmem:[#allocation10_spill] sm:$0xff]  ;;  %v3004_v57 = vld [vmem:[#allocation11_spill] sm:$0xff] }
  0xad   :  { %v1054_v41 = vmul.f32 %v3003_v55, %v3003_v55  ;;  %v3022_v55 = vld [vmem:[#allocation29_spill] sm:$0xff] }
  0xae   :  { %v1672_v11 = vadd.f32 %v1671_v48, %v1030_v56 }
  0xb0   :  { %v1673_v58 = vadd.f32 %v1672_v11, %v1031_v63  ;;  %v1055_v63 = vmul.f32 %v3004_v57, %v3004_v57  ;;  %v3023_v57 = vld [vmem:[#allocation30_spill] sm:$0xff] }
  0xb2   :  { %v1674_v49 = vadd.f32 %v1673_v58, %v1032_v0  ;;  %v3005_v0 = vld [vmem:[#allocation12_spill] sm:$0xff]  ;;  %v3006_v58 = vld [vmem:[#allocation13_spill] sm:$0xff] }
  0xb3   :  { %v1056_v11 = vmul.f32 %v3005_v0, %v3005_v0  ;;  %v3024_v0 = vld [vmem:[#allocation31_spill] sm:$0xff] }
  0xb4   :  { %v1675_v53 = vadd.f32 %v1674_v49, %v1033_v1 }
  0xb6   :  { %v1676_v59 = vadd.f32 %v1675_v53, %v1034_v8  ;;  %v1057_v8 = vmul.f32 %v3006_v58, %v3006_v58  ;;  %v3025_v58 = vld [vmem:[#allocation32_spill] sm:$0xff] }
  0xb8   :  { %v1677_v2 = vadd.f32 %v1676_v59, %v1035_v9  ;;  %v3007_v9 = vld [vmem:[#allocation14_spill] sm:$0xff]  ;;  %v3008_v59 = vld [vmem:[#allocation15_spill] sm:$0xff] }
  0xb9   :  { %v1058_v53 = vmul.f32 %v3007_v9, %v3007_v9  ;;  %v3026_v9 = vld [vmem:[#allocation33_spill] sm:$0xff] }
  0xba   :  { %v1678_v4 = vadd.f32 %v1677_v2, %v1036_v10 }
  0xbc   :  { %v1679_v40 = vadd.f32 %v1678_v4, %v1037_v17  ;;  %v1059_v17 = vmul.f32 %v3008_v59, %v3008_v59  ;;  %v3027_v59 = vld [vmem:[#allocation34_spill] sm:$0xff] }
  0xbe   :  { %v1680_v50 = vadd.f32 %v1679_v40, %v1038_v18  ;;  %v3009_v18 = vld [vmem:[#allocation16_spill] sm:$0xff]  ;;  %v3010_v40 = vld [vmem:[#allocation17_spill] sm:$0xff] }
  0xbf   :  { %v1060_v4 = vmul.f32 %v3009_v18, %v3009_v18  ;;  %v3028_v18 = vld [vmem:[#allocation35_spill] sm:$0xff] }
  0xc0   :  { %v1681_v20 = vadd.f32 %v1680_v50, %v1039_v19 }
  0xc2   :  { %v1682_v7 = vadd.f32 %v1681_v20, %v1040_v30  ;;  %v1061_v30 = vmul.f32 %v3010_v40, %v3010_v40  ;;  %v3029_v40 = vld [vmem:[#allocation36_spill] sm:$0xff] }
  0xc4   :  { %v1683_v27 = vadd.f32 %v1682_v7, %v1041_v31  ;;  %v3011_v31 = vld [vmem:[#allocation18_spill] sm:$0xff]  ;;  %v3012_v7 = vld [vmem:[#allocation19_spill] sm:$0xff] }
  0xc5   :  { %v1062_v20 = vmul.f32 %v3011_v31, %v3011_v31  ;;  %v3030_v31 = vld [vmem:[#allocation37_spill] sm:$0xff] }
  0xc6   :  { %v1684_v52 = vadd.f32 %v1683_v27, %v1042_v32 }
  0xc8   :  { %v1685_v28 = vadd.f32 %v1684_v52, %v1043_v42  ;;  %v1063_v42 = vmul.f32 %v3012_v7, %v3012_v7  ;;  %v3031_v7 = vld [vmem:[#allocation38_spill] sm:$0xff] }
  0xca   :  { %v1686_v39 = vadd.f32 %v1685_v28, %v1044_v43  ;;  %v3013_v43 = vld [vmem:[#allocation20_spill] sm:$0xff]  ;;  %v3014_v28 = vld [vmem:[#allocation21_spill] sm:$0xff] }
  0xcb   :  { %v1064_v52 = vmul.f32 %v3013_v43, %v3013_v43  ;;  %v3032_v43 = vld [vmem:[#allocation39_spill] sm:$0xff] }
  0xcc   :  { %v1687_v3 = vadd.f32 %v1686_v39, %v1045_v44 }
  0xce   :  { %v1688_v51 = vadd.f32 %v1687_v3, %v1046_v60  ;;  %v1065_v60 = vmul.f32 %v3014_v28, %v3014_v28  ;;  %v3033_v28 = vld [vmem:[#allocation40_spill] sm:$0xff] }
  0xd0   :  { %v1689_v34 = vadd.f32 %v1688_v51, %v1047_v61  ;;  %v1066_v61 = vmul.f32 %v3015_v29, %v3015_v29  ;;  %v3034_v29 = vld [vmem:[#allocation41_spill] sm:$0xff] }
  0xd2   :  { %v1690_v24 = vadd.f32 %v1689_v34, %v1048_v62  ;;  %v1067_v62 = vmul.f32 %v3016_v36, %v3016_v36  ;;  %v3035_v36 = vld [vmem:[#allocation42_spill] sm:$0xff] }
  0xd4   :  { %v1691_v33 = vadd.f32 %v1690_v24, %v1049_v14  ;;  %v1068_v14 = vmul.f32 %v3017_v37, %v3017_v37  ;;  %v3036_v37 = vld [vmem:[#allocation43_spill] sm:$0xff] }
  0xd6   :  { %v1692_v47 = vadd.f32 %v1691_v33, %v1050_v15  ;;  %v1069_v15 = vmul.f32 %v3018_v38, %v3018_v38  ;;  %v3037_v38 = vld [vmem:[#allocation44_spill] sm:$0xff] }
  0xd8   :  { %v1693_v22 = vadd.f32 %v1692_v47, %v1051_v16  ;;  %v1070_v16 = vmul.f32 %v3019_v45, %v3019_v45  ;;  %v1089_v45 = vmul.f32 %v2468_v23, %v2468_v23  ;;  %v1094_v23 = vmul.f32 %v2490_v35, %v2490_v35 }
  0xda   :  { %v1694_v56 = vadd.f32 %v1693_v22, %v1052_v12  ;;  %v1071_v12 = vmul.f32 %v3020_v46, %v3020_v46 }
  0xdc   :  { %v1695_v48 = vadd.f32 %v1694_v56, %v1053_v54  ;;  %v1072_v54 = vmul.f32 %v3021_v13, %v3021_v13 }
  0xde   :  { %v1696_v1 = vadd.f32 %v1695_v48, %v1054_v41  ;;  %v1073_v41 = vmul.f32 %v3022_v55, %v3022_v55 }
  0xe0   :  { %v1697_v49 = vadd.f32 %v1696_v1, %v1055_v63  ;;  %v1074_v63 = vmul.f32 %v3023_v57, %v3023_v57 }
  0xe2   :  { %v1698_v10 = vadd.f32 %v1697_v49, %v1056_v11  ;;  %v1075_v11 = vmul.f32 %v3024_v0, %v3024_v0  ;;  %v1096_v0 = vmul.f32 %v2503_v26, %v2503_v26 }
  0xe4   :  { %v1699_v2 = vadd.f32 %v1698_v10, %v1057_v8  ;;  %v1076_v8 = vmul.f32 %v3025_v58, %v3025_v58  ;;  %v3040_v58 = vld [vmem:[#allocation47_spill] sm:$0xff] }
  0xe6   :  { %v1700_v19 = vadd.f32 %v1699_v2, %v1058_v53  ;;  %v1077_v53 = vmul.f32 %v3026_v9, %v3026_v9 }
  0xe8   :  { %v1701_v50 = vadd.f32 %v1700_v19, %v1059_v17  ;;  %v1078_v17 = vmul.f32 %v3027_v59, %v3027_v59  ;;  %v3043_v59 = vld [vmem:[#allocation50_spill] sm:$0xff] }
  0xe9   :  { %v1101_v26 = vmul.f32 %v3043_v59, %v3043_v59 }
  0xea   :  { %v1702_v32 = vadd.f32 %v1701_v50, %v1060_v4  ;;  %v1079_v4 = vmul.f32 %v3028_v18, %v3028_v18 }
  0xec   :  { %v1703_v27 = vadd.f32 %v1702_v32, %v1061_v30  ;;  %v1080_v30 = vmul.f32 %v3029_v40, %v3029_v40 }
  0xee   :  { %v1704_v44 = vadd.f32 %v1703_v27, %v1062_v20  ;;  %v1081_v20 = vmul.f32 %v3030_v31, %v3030_v31 }
  0xf0   :  { %v1705_v39 = vadd.f32 %v1704_v44, %v1063_v42  ;;  %v1082_v42 = vmul.f32 %v3031_v7, %v3031_v7 }
  0xf2   :  { %v1706_v3 = vadd.f32 %v1705_v39, %v1064_v52  ;;  %v1083_v52 = vmul.f32 %v3032_v43, %v3032_v43 }
  0xf4   :  { %v1707_v51 = vadd.f32 %v1706_v3, %v1065_v60  ;;  %v1084_v60 = vmul.f32 %v3033_v28, %v3033_v28 }
  0xf6   :  { %v1708_v34 = vadd.f32 %v1707_v51, %v1066_v61  ;;  %v1085_v61 = vmul.f32 %v3034_v29, %v3034_v29 }
  0xf8   :  { %v1709_v24 = vadd.f32 %v1708_v34, %v1067_v62  ;;  %v1086_v62 = vmul.f32 %v3035_v36, %v3035_v36 }
  0xfa   :  { %v1710_v33 = vadd.f32 %v1709_v24, %v1068_v14  ;;  %v1087_v14 = vmul.f32 %v3036_v37, %v3036_v37 }
  0xfc   :  { %v1711_v47 = vadd.f32 %v1710_v33, %v1069_v15  ;;  %v1088_v15 = vmul.f32 %v3037_v38, %v3037_v38  ;;  %v3038_v33 = vld [vmem:[#allocation45_spill] sm:$0xff] }
  0xfd   :  { %v1090_v46 = vmul.f32 %v3038_v33, %v3038_v33 }
  0xfe   :  { %v1712_v22 = vadd.f32 %v1711_v47, %v1070_v16  ;;  %v3039_v47 = vld [vmem:[#allocation46_spill] sm:$0xff] }
  0xff   :  { %v1091_v13 = vmul.f32 %v3039_v47, %v3039_v47 }
 0x100   :  { %v1713_v56 = vadd.f32 %v1712_v22, %v1071_v12  ;;  %v1092_v22 = vmul.f32 %v2486_v6, %v2486_v6  ;;  %v1097_v6 = vmul.f32 %v2505_v25, %v2505_v25 }
 0x102   :  { %v1714_v48 = vadd.f32 %v1713_v56, %v1072_v54 }
 0x104   :  { %v1715_v1 = vadd.f32 %v1714_v48, %v1073_v41  ;;  %v1093_v41 = vmul.f32 %v2488_v5, %v2488_v5  ;;  %v1098_v5 = vmul.f32 %v3040_v58, %v3040_v58 }
 0x106   :  { %v1716_v49 = vadd.f32 %v1715_v1, %v1074_v63  ;;  %v1095_v63 = vmul.f32 %v2501_v21, %v2501_v21 }
 0x108   :  { %v1717_v10 = vadd.f32 %v1716_v49, %v1075_v11  ;;  %v3041_v49 = vld [vmem:[#allocation48_spill] sm:$0xff] }
 0x109   :  { %v1099_v35 = vmul.f32 %v3041_v49, %v3041_v49 }
 0x10a   :  { %v1718_v2 = vadd.f32 %v1717_v10, %v1076_v8 }
 0x10c   :  { %v1719_v19 = vadd.f32 %v1718_v2, %v1077_v53  ;;  %v3042_v53 = vld [vmem:[#allocation49_spill] sm:$0xff]  ;;  %v3044_v2 = vld [vmem:[#allocation51_spill] sm:$0xff] }
 0x10d   :  { %v1100_v21 = vmul.f32 %v3042_v53, %v3042_v53  ;;  %v1102_v25 = vmul.f32 %v3044_v2, %v3044_v2 }
 0x10e   :  { %v1720_v50 = vadd.f32 %v1719_v19, %v1078_v17 }
 0x110   :  { %v1721_v32 = vadd.f32 %v1720_v50, %v1079_v4  ;;  %v3045_v4 = vld [vmem:[#allocation52_spill] sm:$0xff] }
 0x111   :  { %v1103_v19 = vmul.f32 %v3045_v4, %v3045_v4 }
 0x112   :  { %v1722_v27 = vadd.f32 %v1721_v32, %v1080_v30  ;;  %v3046_v30 = vld [vmem:[#allocation53_spill] sm:$0xff] }
 0x113   :  { %v1104_v50 = vmul.f32 %v3046_v30, %v3046_v30 }
 0x114   :  { %v1723_v44 = vadd.f32 %v1722_v27, %v1081_v20  ;;  %v3047_v20 = vld [vmem:[#allocation54_spill] sm:$0xff] }
 0x115   :  { %v1105_v32 = vmul.f32 %v3047_v20, %v3047_v20 }
 0x116   :  { %v1724_v39 = vadd.f32 %v1723_v44, %v1082_v42  ;;  %v3048_v42 = vld [vmem:[#allocation55_spill] sm:$0xff] }
 0x117   :  { %v1106_v27 = vmul.f32 %v3048_v42, %v3048_v42 }
 0x118   :  { %v1725_v3 = vadd.f32 %v1724_v39, %v1083_v52  ;;  %v3049_v52 = vld [vmem:[#allocation56_spill] sm:$0xff] }
 0x119   :  { %v1107_v44 = vmul.f32 %v3049_v52, %v3049_v52 }
 0x11a   :  { %v1726_v51 = vadd.f32 %v1725_v3, %v1084_v60 }
 0x11c   :  { %v1727_v34 = vadd.f32 %v1726_v51, %v1085_v61 }
 0x11e   :  { %v1728_v24 = vadd.f32 %v1727_v34, %v1086_v62 }
 0x120   :  { %v1729_v16 = vadd.f32 %v1728_v24, %v1087_v14 }
 0x122   :  { %v1730_v12 = vadd.f32 %v1729_v16, %v1088_v15 }
 0x124   :  { %v1731_v54 = vadd.f32 %v1730_v12, %v1089_v45 }
 0x126   :  { %v1732_v55 = vadd.f32 %v1731_v54, %v1090_v46 }
 0x128   :  { %v1733_v56 = vadd.f32 %v1732_v55, %v1091_v13 }
 0x12a   :  { %v1734_v57 = vadd.f32 %v1733_v56, %v1092_v22 }
 0x12c   :  { %v1735_v48 = vadd.f32 %v1734_v57, %v1093_v41 }
 0x12e   :  { %v1736_v11 = vadd.f32 %v1735_v48, %v1094_v23 }
 0x130   :  { %v1737_v1 = vadd.f32 %v1736_v11, %v1095_v63 }
 0x132   :  { %v1738_v8 = vadd.f32 %v1737_v1, %v1096_v0 }
 0x134   :  { %v1739_v9 = vadd.f32 %v1738_v8, %v1097_v6 }
 0x136   :  { %v1740_v10 = vadd.f32 %v1739_v9, %v1098_v5 }
 0x138   :  { %v1741_v17 = vadd.f32 %v1740_v10, %v1099_v35 }
 0x13a   :  { %v1742_v18 = vadd.f32 %v1741_v17, %v1100_v21 }
 0x13c   :  { %v1743_v40 = vadd.f32 %v1742_v18, %v1101_v26 }
 0x13e   :  { %v1744_v31 = vadd.f32 %v1743_v40, %v1102_v25 }
 0x140   :  { %v1745_v7 = vadd.f32 %v1744_v31, %v1103_v19 }
 0x142   :  { %v1746_v43 = vadd.f32 %v1745_v7, %v1104_v50 }
 0x144   :  { %v1747_v28 = vadd.f32 %v1746_v43, %v1105_v32 }
 0x146   :  { %v1748_v60 = vadd.f32 %v1747_v28, %v1106_v27 }
 0x148   :  { %v1749_v39 = vadd.f32 %v1748_v60, %v1107_v44 }
 0x14a   :  { %v1750_v29 = vrot.slane %v1749_v39, 4 }
 0x14c   :  { %v1751_v61 = vadd.f32 %v1750_v29, %v1749_v39 }
 0x14e   :  { %v1752_v3 = vrot.slane %v1751_v61, 2 }
 0x150   :  { %v1753_v36 = vadd.f32 %v1752_v3, %v1751_v61 }
 0x152   :  { %v1754_v62 = vrot.slane %v1753_v36, 1 }
 0x154   :  { %v1755_v51 = vadd.f32 %v1754_v62, %v1753_v36 }
 0x156   :  { %1756 = vst [vmem:[%s2941_s2] sm:$0x1] %v1755_v51 }

</bundles_post_ra>
